<compile_context>
chip_gen: v7x
topology: tpu7x:2x2x1
jax: 0.10.0
libtpu: 0.0.40
codegen_flags: <defaults>
</compile_context>

<pallas_src>
import functools

import jax
import jax.numpy as jnp
from jax.experimental import pallas as pl
from jax.experimental.pallas import tpu as pltpu


def _round_up(x, m):
    return (x + m - 1) // m * m


def _focal_loss_kernel(logits_ref, target_ref, out_ref, *, gamma, n_rows, tile_n):
    step = pl.program_id(0)

    @pl.when(step == 0)
    def _():
        out_ref[...] = jnp.zeros_like(out_ref)

    x = logits_ref[...].astype(jnp.float32)      # (TILE_N, C) -- native dtype upcast here
    t = target_ref[...]                           # (TILE_N, 1) int32

    # log-softmax pieces; only the target column of log_prob is ever consumed.
    m = jnp.max(x, axis=-1, keepdims=True)                       # (TILE_N, 1)
    s = x - m                                                    # (TILE_N, C)
    lse = jnp.log(jnp.sum(jnp.exp(s), axis=-1, keepdims=True))   # (TILE_N, 1)

    # Gather the shifted target logit via one-hot select (no dynamic gather on TPU).
    cls = jax.lax.broadcasted_iota(jnp.int32, x.shape, 1)        # (TILE_N, C)
    s_t = jnp.sum(jnp.where(cls == t, s, 0.0), axis=-1, keepdims=True)  # (TILE_N, 1)

    log_p_t = s_t - lse                                          # (TILE_N, 1)
    p_t = jnp.exp(log_p_t)                                       # (TILE_N, 1)
    one_minus_p = jnp.maximum(1.0 - p_t, 0.0)  # clamp: rounding can push it slightly < 0
    if float(gamma) == 2.0:
        focal_pow = one_minus_p * one_minus_p
    else:
        focal_pow = jnp.power(one_minus_p, jnp.float32(gamma))
    per_sample = -(focal_pow * log_p_t)                          # (TILE_N, 1)

    # Mask rows past the true batch size (boundary padding of the last tile).
    row = step * tile_n + jax.lax.broadcasted_iota(jnp.int32, per_sample.shape, 0)
    per_sample = jnp.where(row < n_rows, per_sample, 0.0)

    out_ref[...] += jnp.sum(per_sample, axis=0, keepdims=True)

    @pl.when(step == pl.num_programs(0) - 1)
    def _():
        out_ref[...] = out_ref[...] / jnp.float32(n_rows)


def focal_loss(logits, targets, gamma=2.0, tile_n=None):
    """logits: (N, C) float (any float dtype); targets: (N,) int.

    Returns (scalar loss, {'T': loss}) matching the PyTorch FocalLoss forward.
    """
    n, c = logits.shape
    targets_2d = targets.astype(jnp.int32).reshape(n, 1)

    if tile_n is None:
        # Keep a single logits tile around ~4 MiB so 2x double-buffering stays well
        # under the scoped VMEM limit on v5e/v6e/v7x; cap at 1024 rows.
        bytes_per_row = c * jnp.dtype(logits.dtype).itemsize
        budget_rows = max(8, (4 * 1024 * 1024) // max(bytes_per_row, 1))
        tile_n = min(_round_up(n, 8), _round_up(min(budget_rows, 1024), 8))
    tile_n = max(8, _round_up(tile_n, 8))

    grid = (pl.cdiv(n, tile_n),)

    kernel = functools.partial(
        _focal_loss_kernel, gamma=gamma, n_rows=n, tile_n=tile_n
    )

    out = pl.pallas_call(
        kernel,
        out_shape=jax.ShapeDtypeStruct((1, 1), jnp.float32),
        grid_spec=pltpu.PrefetchScalarGridSpec(
            num_scalar_prefetch=0,
            grid=grid,
            in_specs=[
                pl.BlockSpec((tile_n, c), lambda i: (i, 0)),   # logits tile (native dtype)
                pl.BlockSpec((tile_n, 1), lambda i: (i, 0)),   # targets tile
            ],
            out_specs=pl.BlockSpec((1, 1), lambda i: (0, 0)),  # resident accumulator
        ),
        compiler_params=pltpu.CompilerParams(
            dimension_semantics=("arbitrary",),  # reduction axis carries the accumulator
        ),
    )(logits, targets_2d)

    loss = out[0, 0]
    # TODO(synk): PyTorch returns loss.item() (host float) in the aux dict; here we
    # return the traced scalar, which is the closest jit-compatible equivalent.
    return loss, {"T": loss}


def _focal_loss_ref(logits, targets, gamma=2.0):
    log_prob = jax.nn.log_softmax(logits.astype(jnp.float32), axis=-1)
    prob = jnp.exp(log_prob)
    focal = ((1.0 - prob) ** gamma) * log_prob
    picked = jnp.take_along_axis(focal, targets[:, None].astype(jnp.int32), axis=-1)
    return jnp.mean(-picked)


if __name__ == "__main__":
    key = jax.random.PRNGKey(0)
    k1, k2, k3, k4 = jax.random.split(key, 4)

    # Small shape consistent with a classification head: batch=8, classes=32.
    N, C = 8, 32
    logits = jax.random.normal(k1, (N, C), dtype=jnp.float32)
    targets = jax.random.randint(k2, (N,), 0, C, dtype=jnp.int32)

    loss, aux = focal_loss(logits, targets, gamma=2.0)
    loss = jax.block_until_ready(loss)
    ref = _focal_loss_ref(logits, targets, gamma=2.0)
    assert jnp.allclose(loss, ref, atol=1e-5, rtol=1e-5), (loss, ref)

    # Multi-tile + boundary-padding path (N not a multiple of the tile), bf16 input
    # exercised in its native dtype (no wrapper-side f32 upcast).
    N2, C2 = 40, 32
    logits2 = jax.random.normal(k3, (N2, C2), dtype=jnp.float32).astype(jnp.bfloat16)
    targets2 = jax.random.randint(k4, (N2,), 0, C2, dtype=jnp.int32)

    loss2, _ = focal_loss(logits2, targets2, gamma=2.0, tile_n=16)
    loss2 = jax.block_until_ready(loss2)
    ref2 = _focal_loss_ref(logits2.astype(jnp.float32), targets2, gamma=2.0)
    assert jnp.allclose(loss2, ref2, atol=1e-5, rtol=1e-5), (loss2, ref2)

    print("KERNEL_OK")
</pallas_src>

<mosaic_0001>
module attributes {stable_mosaic.version = 11 : i64} {
  func.func @_focal_loss_kernel(%arg0: i32, %arg1: memref<8x32xf32, #tpu.memory_space<vmem>>, %arg2: memref<8x1xi32, #tpu.memory_space<vmem>>, %arg3: memref<1x1xf32, #tpu.memory_space<vmem>>) attributes {dimension_semantics = [#tpu.dimension_semantics<arbitrary>], iteration_bounds = array<i64: 1>, scalar_prefetch = 0 : i64, scratch_operands = 0 : i64, tpu.core_type = #tpu.core_type<tc>, window_params = [{transform_indices = @transform_0, window_bounds = array<i64: 8, 32>}, {transform_indices = @transform_1, window_bounds = array<i64: 8, 1>}, {pipeline_mode = #tpu.pipeline_mode<synchronous>, transform_indices = @transform_2, window_bounds = array<i64: 1, 1>}]} {
    %c0_i32 = arith.constant 0 : i32
    %0 = arith.cmpi eq, %arg0, %c0_i32 : i32
    %1 = arith.extui %0 : i1 to i32
    %c0_i32_0 = arith.constant 0 : i32
    %2 = arith.cmpi ne, %1, %c0_i32_0 : i32
    scf.if %2 {
      %cst_19 = arith.constant 0.000000e+00 : f32
      %46 = vector.broadcast %cst_19 : f32 to vector<1x1xf32>
      %c0_20 = arith.constant 0 : index
      %c0_21 = arith.constant 0 : index
      %47 = vector.load %arg3[%c0_20, %c0_21] : memref<1x1xf32, #tpu.memory_space<vmem>>, vector<1x1xf32>
      tpu.vector_store %arg3[%c0_20, %c0_21], %46 {strides = array<i32>} : memref<1x1xf32, #tpu.memory_space<vmem>>, vector<1x1xf32>,
    } else {
    }
    %c0 = arith.constant 0 : index
    %c0_1 = arith.constant 0 : index
    %3 = vector.load %arg1[%c0, %c0_1] : memref<8x32xf32, #tpu.memory_space<vmem>>, vector<8x32xf32>
    %c0_2 = arith.constant 0 : index
    %c0_3 = arith.constant 0 : index
    %4 = vector.load %arg2[%c0_2, %c0_3] : memref<8x1xi32, #tpu.memory_space<vmem>>, vector<8x1xi32>
    %cst = arith.constant dense<0xFF800000> : vector<8xf32>
    %5 = vector.multi_reduction <maximumf>, %3, %cst [1] : vector<8x32xf32> to vector<8xf32>
    %6 = vector.shape_cast %5 : vector<8xf32> to vector<8x1xf32>
    %7 = vector.broadcast %6 : vector<8x1xf32> to vector<8x32xf32>
    %8 = arith.subf %3, %7 : vector<8x32xf32>
    %9 = math.exp %8 : vector<8x32xf32>
    %cst_4 = arith.constant dense<0.000000e+00> : vector<8xf32>
    %10 = vector.multi_reduction <add>, %9, %cst_4 [1] : vector<8x32xf32> to vector<8xf32>
    %11 = vector.shape_cast %10 : vector<8xf32> to vector<8x1xf32>
    %12 = math.log %11 : vector<8x1xf32>
    %13 = tpu.iota {dimensions = array<i32: 1>} : vector<8x32xi32>
    %14 = vector.broadcast %4 : vector<8x1xi32> to vector<8x32xi32>
    %15 = arith.cmpi eq, %13, %14 : vector<8x32xi32>
    %cst_5 = arith.constant 0.000000e+00 : f32
    %16 = vector.broadcast %cst_5 : f32 to vector<8x32xf32>
    %17 = arith.select %15, %8, %16 : vector<8x32xi1>, vector<8x32xf32>
    %cst_6 = arith.constant dense<0.000000e+00> : vector<8xf32>
    %18 = vector.multi_reduction <add>, %17, %cst_6 [1] : vector<8x32xf32> to vector<8xf32>
    %19 = vector.shape_cast %18 : vector<8xf32> to vector<8x1xf32>
    %20 = arith.subf %19, %12 : vector<8x1xf32>
    %21 = math.exp %20 : vector<8x1xf32>
    %cst_7 = arith.constant 1.000000e+00 : f32
    %22 = vector.broadcast %cst_7 : f32 to vector<8x1xf32>
    %23 = arith.subf %22, %21 : vector<8x1xf32>
    %cst_8 = arith.constant 0.000000e+00 : f32
    %24 = vector.broadcast %cst_8 : f32 to vector<8x1xf32>
    %25 = arith.maximumf %23, %24 : vector<8x1xf32>
    %26 = arith.mulf %25, %25 : vector<8x1xf32>
    %27 = arith.mulf %26, %20 : vector<8x1xf32>
    %cst_9 = arith.constant 0.000000e+00 : f32
    %28 = vector.broadcast %cst_9 : f32 to vector<8x1xf32>
    %29 = arith.subf %28, %27 : vector<8x1xf32>
    %c8_i32 = arith.constant 8 : i32
    %30 = arith.muli %arg0, %c8_i32 : i32
    %31 = tpu.iota {dimensions = array<i32: 0>} : vector<8x1xi32>
    %32 = vector.broadcast %30 : i32 to vector<8x1xi32>
    %33 = arith.addi %32, %31 : vector<8x1xi32>
    %c8_i32_10 = arith.constant 8 : i32
    %34 = vector.broadcast %c8_i32_10 : i32 to vector<8x1xi32>
    %35 = arith.cmpi slt, %33, %34 : vector<8x1xi32>
    %cst_11 = arith.constant 0.000000e+00 : f32
    %36 = vector.broadcast %cst_11 : f32 to vector<8x1xf32>
    %37 = arith.select %35, %29, %36 : vector<8x1xi1>, vector<8x1xf32>
    %c0_12 = arith.constant 0 : index
    %c0_13 = arith.constant 0 : index
    %38 = vector.load %arg3[%c0_12, %c0_13] : memref<1x1xf32, #tpu.memory_space<vmem>>, vector<1x1xf32>
    %cst_14 = arith.constant dense<0.000000e+00> : vector<1xf32>
    %39 = vector.multi_reduction <add>, %37, %cst_14 [0] : vector<8x1xf32> to vector<1xf32>
    %40 = vector.shape_cast %39 : vector<1xf32> to vector<1x1xf32>
    %41 = arith.addf %38, %40 : vector<1x1xf32>
    %c0_15 = arith.constant 0 : index
    %c0_16 = arith.constant 0 : index
    %42 = vector.load %arg3[%c0_15, %c0_16] : memref<1x1xf32, #tpu.memory_space<vmem>>, vector<1x1xf32>
    tpu.vector_store %arg3[%c0_15, %c0_16], %41 {strides = array<i32>} : memref<1x1xf32, #tpu.memory_space<vmem>>, vector<1x1xf32>,
    %c0_i32_17 = arith.constant 0 : i32
    %43 = arith.cmpi eq, %arg0, %c0_i32_17 : i32
    %44 = arith.extui %43 : i1 to i32
    %c0_i32_18 = arith.constant 0 : i32
    %45 = arith.cmpi ne, %44, %c0_i32_18 : i32
    scf.if %45 {
      %c0_19 = arith.constant 0 : index
      %c0_20 = arith.constant 0 : index
      %46 = vector.load %arg3[%c0_19, %c0_20] : memref<1x1xf32, #tpu.memory_space<vmem>>, vector<1x1xf32>
      %cst_21 = arith.constant 8.000000e+00 : f32
      %47 = vector.broadcast %cst_21 : f32 to vector<1x1xf32>
      %48 = arith.divf %46, %47 : vector<1x1xf32>
      %c0_22 = arith.constant 0 : index
      %c0_23 = arith.constant 0 : index
      %49 = vector.load %arg3[%c0_22, %c0_23] : memref<1x1xf32, #tpu.memory_space<vmem>>, vector<1x1xf32>
      tpu.vector_store %arg3[%c0_22, %c0_23], %48 {strides = array<i32>} : memref<1x1xf32, #tpu.memory_space<vmem>>, vector<1x1xf32>,
    } else {
    }
    return
  }
  func.func @transform_0(%arg0: i32) -> (i32, i32) {
    %c0_i32 = arith.constant 0 : i32
    %c0_i32_0 = arith.constant 0 : i32
    return %arg0, %c0_i32 : i32, i32
  }
  func.func @transform_1(%arg0: i32) -> (i32, i32) {
    %c0_i32 = arith.constant 0 : i32
    %c0_i32_0 = arith.constant 0 : i32
    return %arg0, %c0_i32 : i32, i32
  }
  func.func @transform_2(%arg0: i32) -> (i32, i32) {
    %c0_i32 = arith.constant 0 : i32
    %c0_i32_0 = arith.constant 0 : i32
    %c0_i32_1 = arith.constant 0 : i32
    return %c0_i32, %c0_i32_0 : i32, i32
  }
}

</mosaic_0001>

<bundles_post_ra>
// kernel: tpu_custom_call.1
= control target key start
LH: loop header
LB: loop body
LE: loop exit
PB: predicated region body
PF: predicated region fallthrough
CT: control target
= control target key end

     0   :  { %vm20_vm0 = vcmask 261120   ;;  %s164_s0 = inlined_call_operand.vmem [shape: f32[8,32], index: 0, kind: input, shape index: {}]   ;;  %s165_s1 = inlined_call_operand.vmem [shape: s32[8,1], index: 1, kind: input, shape index: {}]   ;;  %s166_s2 = inlined_call_operand.hbm [shape: f32[1,1], index: 2, kind: output, shape index: {}]  }
   0x1   :  { %v18_v0 = vld [vmem:[%s164_s0] sm:$0xff] }
   0x2   :  { %7 = vsyncpa [#allocation3], 0  ;;  %v21_v1 = vsel %vm20_vm0, %v18_v0, -inf  ;;  %v122_v2 = vmov 0   ;;  %v19_v3 = vld [vmem:[%s165_s1] sm:$0xff]  ;;  %v32_v7 = vlaneseq  ;;  %vm16_vm2 = vcmask 0  }
   0x3   :  { %91 = vset.pattern.permute.xlu0 %v122_v2  ;;  %v123_v14 = vmov 0.0   ;;  %s124_s0 = smov [#allocation2]  }
   0x4   :  { %22 = vmax.xlane.f32.xlu0 %v21_v1  ;;  %v33_v8 = vand.u32 127, %v32_v7  ;;  %17 = vst.msk [vmem:[#allocation2] sm:$0x1] %vm16_vm2, %v123_v14  ;;  %s80_s1 = sshll.u32 %s124_s0, 4  ;;  %s81_s1 = int_to_ptr.vmem [resolvable:$true] %s80_s1 }
   0x5   :  { %s98_s13 = scalar_lea.vmem %s81_s1, 16  ;;  %s102_s14 = scalar_lea.vmem %s81_s1, 32 }
   0x6   :  { %p99_p0 = scmp.ne.s32.totalorder %s81_s1, %s98_s13  ;;  %p103_p1 = scmp.lt.s32.totalorder %s81_s1, %s81_s1 }
   0x7   :  { %p104_p2 = scmp.lt.s32.totalorder %s102_s14, %s98_s13 }
   0x9   :  { %p105_p3 = por %p104_p2, %p103_p1 }
   0xb   :  { %v57_v32 = vld [vmem:[#allocation2] sm:$0x1]  ;;  %p106_p4 = pnand %p105_p3, %p99_p0 }
  0x1a   :  { %35 = vperm.xlu0 %91, %v19_v3  }
  0x91   :  { %v23_v4 = vpop.xlane.xlu0 %22 }
  0x92   :  { %v24_v5 = vsub.f32 %v18_v0, %v23_v4 }
  0x94   :  { %v25_v6 = vmul.f32 1.442695, %v24_v5 }
  0x96   :  { %92 = vpow2.f32 %v25_v6 }
  0x99   :  { %v36_v9 = vpop.permute.xlu0 %35 }
  0x9a   :  { %vm37_vm1 = vcmp.eq.s32.totalorder %v33_v8, %v36_v9 }
  0x9b   :  { %v38_v12 = vsel %vm37_vm1, %v24_v5, 0.0 }
  0x9c   :  { %v39_v13 = vsel %vm20_vm0, %v38_v12, 0.0 }
  0xa0   :  { %v93_v10 = vpop.eup %92 }
  0xa1   :  { %v27_v11 = vsel %vm20_vm0, %v93_v10, 0.0 }
  0xa2   :  { %28 = vadd.xlane.f32.xlu1 %v27_v11 }
  0xa6   :  { %40 = vadd.xlane.f32.xlu1 %v39_v13 }
 0x12f   :  { %v29_v15 = vpop.xlane.xlu1 %28 }
 0x130   :  { %94 = vlog2.f32 %v29_v15 }
 0x133   :  { %v41_v18 = vpop.xlane.xlu1 %40 }
 0x13a   :  { %v95_v16 = vpop.eup %94 }
 0x13b   :  { %v31_v17 = vmul.f32 0.6931472, %v95_v16 }
 0x13d   :  { %v42_v19 = vsub.f32 %v41_v18, %v31_v17 }
 0x13f   :  { %v43_v20 = vmul.f32 1.442695, %v42_v19 }
 0x141   :  { %96 = vpow2.f32 %v43_v20 }
 0x14b   :  { %v97_v21 = vpop.eup %96 }
 0x14c   :  { %v45_v22 = vsub.f32 1.0, %v97_v21 }
 0x14e   :  { %v46_v23 = vmax.f32 %v45_v22, 0.0 }
 0x150   :  { %v47_v24 = vmul.f32 %v46_v23, %v46_v23 }
 0x152   :  { %v48_v25 = vmul.f32 %v47_v24, %v42_v19 }
 0x154   :  { %v49_v26 = vsub.f32 0.0, %v48_v25 }
 0x156   :  { %v58_v27 = vrot.slane %v49_v26, 4 }
 0x158   :  { %v59_v28 = vadd.f32 %v58_v27, %v49_v26 }
 0x15a   :  { %v60_v29 = vrot.slane %v59_v28, 2 }
 0x15c   :  { %v61_v30 = vadd.f32 %v60_v29, %v59_v28 }
 0x15e   :  { %v62_v31 = vrot.slane %v61_v30, 1 }
 0x160   :  { %v63_v33 = vadd.f32 %v62_v31, %v61_v30 }
 0x162   :  { %v64_v34 = vadd.f32 %v63_v33, %v57_v32 }
 0x164   :  { %66 = vst.msk [vmem:[#allocation2] sm:$0x1] %vm16_vm2, %v64_v34 }
 0x16b   :  { %v70_v35 = vld [vmem:[#allocation2] sm:$0x1] }
 0x16c   :  { %v72_v36 = vmul.f32 0.125, %v70_v35 }
 0x16e   :  { %73 = vst.msk [vmem:[#allocation2] sm:$0x1] %vm16_vm2, %v72_v36 }
 0x16f   :  { %109 = shalt.err (!%p106_p4)
}
 0x170   :  { %s110_s17 = scalar_lea.hbm %s166_s2, 16 }
 0x171   :  { %p111_p5 = scmp.ne.s32.totalorder %s166_s2, %s110_s17  ;;  %p114_p6 = scmp.lt.u32.totalorder %s110_s17, %s166_s2 }
 0x173   :  { %p116_p7 = pnand %p114_p6, %p111_p5 }
 0x175   :  { %119 = shalt.err (!%p116_p7)
}
 0x176   :  { %83 = dma.vmem_to_hbm [thread:$0]  %s81_s1, 16, %s166_s2, [#allocation3]  }
 0x177   :  { %120 = dma.done.wait [#allocation3], 16  }
 0x178   :  { %121 = vsyncadd [#allocation3], 4294967280 }
 0x179   :  { %87 = vsyncpa [#allocation3], 1 }

</bundles_post_ra>
